<compile_context>
chip_gen: v6e
topology: v6e:2x2x1
jax: 0.10.0
libtpu: 0.0.40
codegen_flags: <defaults>
</compile_context>

<pallas_src>
import numpy as np

import jax
import jax.numpy as jnp
from jax.experimental import pallas as pl
from jax.experimental.pallas import tpu as pltpu


SIZES = (1, 2, 3, 6)


def _adaptive_pool_matrix(H, W, s):
    """(s*s, H*W) matrix implementing nn.AdaptiveAvgPool2d((s, s)) on flattened HW."""
    P = np.zeros((s * s, H * W), np.float32)
    for i in range(s):
        y0 = (i * H) // s
        y1 = ((i + 1) * H + s - 1) // s
        for j in range(s):
            x0 = (j * W) // s
            x1 = ((j + 1) * W + s - 1) // s
            cnt = (y1 - y0) * (x1 - x0)
            for y in range(y0, y1):
                for x in range(x0, x1):
                    P[i * s + j, y * W + x] = 1.0 / cnt
    return P


def _bilinear_up_matrix(H, W, s):
    """(H*W, s*s) matrix: bilinear upsample (s,s)->(H,W), align_corners=True."""
    U = np.zeros((H * W, s * s), np.float32)
    for oy in range(H):
        if s == 1 or H == 1:
            y0 = y1 = 0
            wy = 0.0
        else:
            sy = oy * (s - 1) / (H - 1)
            y0 = int(np.floor(sy))
            y1 = min(y0 + 1, s - 1)
            wy = sy - y0
        for ox in range(W):
            if s == 1 or W == 1:
                x0 = x1 = 0
                wx = 0.0
            else:
                sx = ox * (s - 1) / (W - 1)
                x0 = int(np.floor(sx))
                x1 = min(x0 + 1, s - 1)
                wx = sx - x0
            r = oy * W + ox
            U[r, y0 * s + x0] += (1.0 - wy) * (1.0 - wx)
            U[r, y0 * s + x1] += (1.0 - wy) * wx
            U[r, y1 * s + x0] += wy * (1.0 - wx)
            U[r, y1 * s + x1] += wy * wx
    return U


def _pick_tile_rows(HW, max_rows=1024):
    """Largest multiple-of-8 divisor of HW that is <= max_rows."""
    best = None
    for t in range(8, min(HW, max_rows) + 1, 8):
        if HW % t == 0:
            best = t
    return best


def _vmem_budget_bytes(tile_rows, C, SP, OUT):
    # double-buffered streaming tiles: x (bf16), u (f32), out (bf16)
    stream = 2 * tile_rows * (C * 2 + SP * 4 + OUT * 2)
    # resident-ish operands (conservatively double-buffered): M (f32), W_feat (bf16), bias (f32)
    resident = 2 * (SP * OUT * 4 + C * OUT * 2 + OUT * 4)
    return stream + resident


def psp_kernel(x_ref, u_ref, m_ref, w_ref, b_ref, o_ref):
    # feats (identity) branch of the channel concat: (TILE, C) @ (C, OUT), bf16 -> f32 acc
    feat = jnp.dot(x_ref[...], w_ref[...], preferred_element_type=jnp.float32)
    # pyramid branches: bilinear-interp weights (TILE, SP) @ per-image fused stage maps (SP, OUT), f32
    pyr = jnp.dot(u_ref[...], m_ref[0], preferred_element_type=jnp.float32)
    # bottleneck bias + ReLU in f32, store bf16 (halves the dominant HBM stream)
    o_ref[...] = jnp.maximum(feat + pyr + b_ref[...], 0.0).astype(o_ref.dtype)


def psp_module_forward(x_nchw, stage_weights, wb_oihw, wb_bias,
                       *, sizes=SIZES, tile_rows=None, max_tile_rows=1024):
    N, C, H, W = x_nchw.shape
    HW = H * W
    OUT = wb_oihw.shape[0]
    n_stages = len(sizes)
    assert wb_oihw.shape[1] == C * (n_stages + 1), "bottleneck in-channels mismatch"

    if tile_rows is None:
        tile_rows = _pick_tile_rows(HW, max_tile_rows)
    assert tile_rows is not None and HW % tile_rows == 0 and tile_rows % 8 == 0, \
        "tile_rows must divide H*W and be a multiple of 8"
    # TODO(synk): ragged H*W (no multiple-of-8 divisor) would need masked edge tiles.
    n_tiles = HW // tile_rows

    hp = jax.lax.Precision.HIGHEST
    wb2d = wb_oihw[:, :, 0, 0]                                    # (OUT, (S+1)*C)

    # ---- tiny per-image precompute, single pass over x for pooling ----
    # All pool operators stacked into one (SP, HW) matrix; pooling is over HW and is
    # layout independent, so it is applied directly to NCHW (no f32 NHWC intermediate).
    seg_sizes = [s * s for s in sizes]
    SP = sum(seg_sizes)                                           # 1+4+9+36 = 50, unpadded
    P_all = np.concatenate([_adaptive_pool_matrix(H, W, s) for s in sizes], axis=0)
    pooled_all = jnp.einsum('pq,ncq->npc', jnp.asarray(P_all),
                            x_nchw.reshape(N, C, HW).astype(jnp.float32),
                            precision=hp)                         # (N, SP, C)

    u_np = np.zeros((HW, SP), np.float32)
    m_parts = []
    off = 0
    for idx, s in enumerate(sizes):
        seg = pooled_all[:, off:off + s * s, :]                   # (N, s^2, C)
        ws2d = stage_weights[idx][:, :, 0, 0]                     # (C_out, C_in) = (C, C)
        wb_blk = wb2d[:, idx * C:(idx + 1) * C]                   # (OUT, C)
        wf = jnp.einsum('dc,od->co', ws2d, wb_blk, precision=hp)  # = Ws^T @ Wb_s^T : (C, OUT)
        m_parts.append(jnp.einsum('npc,co->npo', seg, wf, precision=hp))  # (N, s^2, OUT)
        u_np[:, off:off + s * s] = _bilinear_up_matrix(H, W, s)
        off += s * s
    m_all = jnp.concatenate(m_parts, axis=1)                      # (N, SP, OUT), f32 (tiny)

    w_feat = wb2d[:, n_stages * C:].T.astype(jnp.bfloat16)        # (C, OUT) feats branch
    bias = wb_bias.reshape(1, OUT).astype(jnp.float32)
    u_all = jnp.asarray(u_np)                                     # (HW, SP), f32

    # channels-last flattened rows (n, h, w) x C, bf16 MXU operand, single fused pass
    x2d = jnp.transpose(x_nchw, (0, 2, 3, 1)).reshape(N * HW, C).astype(jnp.bfloat16)

    vmem_limit = min(48 * 1024 * 1024,
                     max(8 * 1024 * 1024, 4 * _vmem_budget_bytes(tile_rows, C, SP, OUT)))

    flops = 2 * N * HW * (C + SP) * OUT
    bytes_accessed = (N * HW * C * 2 + HW * SP * 4 + N * SP * OUT * 4
                      + C * OUT * 2 + OUT * 4 + N * HW * OUT * 2)

    # grid = (spatial tile, image): the U tile's block index depends only on the tile
    # axis, so Pallas keeps it resident across the inner image loop (no re-DMA).
    out2d = pl.pallas_call(
        psp_kernel,
        out_shape=jax.ShapeDtypeStruct((N * HW, OUT), jnp.bfloat16),
        grid=(n_tiles, N),
        in_specs=[
            pl.BlockSpec((tile_rows, C), lambda t, n: (n * n_tiles + t, 0)),   # x rows (bf16)
            pl.BlockSpec((tile_rows, SP), lambda t, n: (t, 0)),                # interp weights (f32)
            pl.BlockSpec((1, SP, OUT), lambda t, n: (n, 0, 0)),                # per-image stage maps (f32)
            pl.BlockSpec((C, OUT), lambda t, n: (0, 0)),                       # feats weight (resident)
            pl.BlockSpec((1, OUT), lambda t, n: (0, 0)),                       # bias (resident)
        ],
        out_specs=pl.BlockSpec((tile_rows, OUT), lambda t, n: (n * n_tiles + t, 0)),
        compiler_params=pltpu.CompilerParams(
            dimension_semantics=("parallel", "parallel"),
            vmem_limit_bytes=vmem_limit,
        ),
        cost_estimate=pl.CostEstimate(flops=flops, transcendentals=0,
                                      bytes_accessed=bytes_accessed),
    )(x2d, u_all, m_all, w_feat, bias)

    # NCHW, bf16 (kept bf16 so the kernel's halved output stream isn't re-expanded)
    return out2d.reshape(N, H, W, OUT).transpose(0, 3, 1, 2)


def reference_forward(x_nchw, stage_weights, wb_oihw, wb_bias, *, sizes=SIZES):
    """Unfused f32 reference of PSPModule.forward (pool -> conv -> upsample -> cat -> conv -> relu)."""
    N, C, H, W = x_nchw.shape
    HW = H * W
    hp = jax.lax.Precision.HIGHEST
    xf = jnp.transpose(x_nchw, (0, 2, 3, 1)).reshape(N, HW, C).astype(jnp.float32)
    priors = []
    for idx, s in enumerate(sizes):
        P = jnp.asarray(_adaptive_pool_matrix(H, W, s))
        U = jnp.asarray(_bilinear_up_matrix(H, W, s))
        pooled = jnp.einsum('pq,nqc->npc', P, xf, precision=hp)
        conv = jnp.einsum('npc,dc->npd', pooled, stage_weights[idx][:, :, 0, 0], precision=hp)
        up = jnp.einsum('rp,npd->nrd', U, conv, precision=hp)
        priors.append(up)
    priors.append(xf)                                             # feats last, as in the module
    cat = jnp.concatenate(priors, axis=-1)                        # (N, HW, (S+1)*C)
    out = jnp.einsum('nrk,ok->nro', cat, wb_oihw[:, :, 0, 0], precision=hp) + wb_bias
    out = jnp.maximum(out, 0.0)
    return out.reshape(N, H, W, -1).transpose(0, 3, 1, 2)


if __name__ == "__main__":
    # small shapes consistent with the module: PSPModule(features=16, out_features=128)
    N, C, H, W = 2, 16, 16, 16
    OUT = 128
    sizes = SIZES

    key = jax.random.PRNGKey(0)
    ks = jax.random.split(key, 3 + len(sizes))

    x = jax.random.normal(ks[0], (N, C, H, W), jnp.float32)
    # stage 1x1 convs (bias=False), PyTorch OIHW convention
    stage_ws = [jax.random.normal(ks[3 + i], (C, C, 1, 1), jnp.float32) / np.sqrt(C)
                for i in range(len(sizes))]
    # bottleneck 1x1 conv (with bias)
    wb = jax.random.normal(ks[1], (OUT, C * (len(sizes) + 1), 1, 1), jnp.float32) \
        / np.sqrt(C * (len(sizes) + 1))
    bb = 0.1 * jax.random.normal(ks[2], (OUT,), jnp.float32)

    out = psp_module_forward(x, stage_ws, wb, bb, sizes=sizes)
    out = jax.block_until_ready(out)

    ref = reference_forward(x, stage_ws, wb, bb, sizes=sizes)
    err = float(jnp.max(jnp.abs(out.astype(jnp.float32) - ref)))
    scale = float(jnp.max(jnp.abs(ref))) + 1e-6
    assert out.shape == (N, OUT, H, W), out.shape
    assert err / scale < 3e-2, f"relative error too large: {err} (scale {scale})"
    print("KERNEL_OK")
</pallas_src>

<mosaic_0001>
module attributes {stable_mosaic.version = 11 : i64} {
  func.func @psp_kernel(%arg0: i32, %arg1: i32, %arg2: memref<256x16xbf16, #tpu.memory_space<vmem>>, %arg3: memref<256x50xf32, #tpu.memory_space<vmem>>, %arg4: memref<1x50x128xf32, #tpu.memory_space<vmem>>, %arg5: memref<16x128xbf16, #tpu.memory_space<vmem>>, %arg6: memref<1x128xf32, #tpu.memory_space<vmem>>, %arg7: memref<256x128xbf16, #tpu.memory_space<vmem>>) attributes {dimension_semantics = [#tpu.dimension_semantics<parallel>, #tpu.dimension_semantics<parallel>], iteration_bounds = array<i64: 1, 2>, scalar_prefetch = 0 : i64, scratch_operands = 0 : i64, tpu.core_type = #tpu.core_type<tc>, window_params = [{transform_indices = @transform_0, window_bounds = array<i64: 256, 16>}, {transform_indices = @transform_1, window_bounds = array<i64: 256, 50>}, {transform_indices = @transform_2, window_bounds = array<i64: 1, 50, 128>}, {pipeline_mode = #tpu.pipeline_mode<synchronous>, transform_indices = @transform_3, window_bounds = array<i64: 16, 128>}, {pipeline_mode = #tpu.pipeline_mode<synchronous>, transform_indices = @transform_4, window_bounds = array<i64: 1, 128>}, {transform_indices = @transform_5, window_bounds = array<i64: 256, 128>}]} {
    %c0 = arith.constant 0 : index
    %c0_0 = arith.constant 0 : index
    %0 = vector.load %arg2[%c0, %c0_0] : memref<256x16xbf16, #tpu.memory_space<vmem>>, vector<256x16xbf16>
    %c0_1 = arith.constant 0 : index
    %c0_2 = arith.constant 0 : index
    %1 = vector.load %arg5[%c0_1, %c0_2] : memref<16x128xbf16, #tpu.memory_space<vmem>>, vector<16x128xbf16>
    %cst = arith.constant dense<0.000000e+00> : vector<256x128xf32>
    %2 = tpu.matmul %0, %1, %cst {dimension_numbers = #tpu.dot_dimension_numbers<[1], [0], [0], [1], [0, 0, 1, 1], [], []>} : vector<256x16xbf16>, vector<16x128xbf16>, vector<256x128xf32> -> vector<256x128xf32>
    %c0_3 = arith.constant 0 : index
    %c0_4 = arith.constant 0 : index
    %3 = vector.load %arg3[%c0_3, %c0_4] : memref<256x50xf32, #tpu.memory_space<vmem>>, vector<256x50xf32>
    %c0_5 = arith.constant 0 : index
    %c0_6 = arith.constant 0 : index
    %c0_7 = arith.constant 0 : index
    %4 = vector.load %arg4[%c0_5, %c0_6, %c0_7] : memref<1x50x128xf32, #tpu.memory_space<vmem>>, vector<1x50x128xf32>
    %5 = vector.shape_cast %4 : vector<1x50x128xf32> to vector<50x128xf32>
    %cst_8 = arith.constant dense<0.000000e+00> : vector<256x128xf32>
    %6 = tpu.matmul %3, %5, %cst_8 {dimension_numbers = #tpu.dot_dimension_numbers<[1], [0], [0], [1], [0, 0, 1, 1], [], []>} : vector<256x50xf32>, vector<50x128xf32>, vector<256x128xf32> -> vector<256x128xf32>
    %7 = arith.addf %2, %6 : vector<256x128xf32>
    %c0_9 = arith.constant 0 : index
    %c0_10 = arith.constant 0 : index
    %8 = vector.load %arg6[%c0_9, %c0_10] : memref<1x128xf32, #tpu.memory_space<vmem>>, vector<1x128xf32>
    %9 = vector.broadcast %8 : vector<1x128xf32> to vector<256x128xf32>
    %10 = arith.addf %7, %9 : vector<256x128xf32>
    %cst_11 = arith.constant 0.000000e+00 : f32
    %11 = vector.broadcast %cst_11 : f32 to vector<256x128xf32>
    %12 = arith.maximumf %10, %11 : vector<256x128xf32>
    %13 = arith.truncf %12 : vector<256x128xf32> to vector<256x128xbf16>
    %c0_12 = arith.constant 0 : index
    %c0_13 = arith.constant 0 : index
    %14 = vector.load %arg7[%c0_12, %c0_13] : memref<256x128xbf16, #tpu.memory_space<vmem>>, vector<256x128xbf16>
    tpu.vector_store %arg7[%c0_12, %c0_13], %13 {strides = array<i32>} : memref<256x128xbf16, #tpu.memory_space<vmem>>, vector<256x128xbf16>,
    return
  }
  func.func @transform_0(%arg0: i32, %arg1: i32) -> (i32, i32) {
    %c1_i32 = arith.constant 1 : i32
    %0 = arith.muli %arg1, %c1_i32 : i32
    %1 = arith.addi %0, %arg0 : i32
    %c0_i32 = arith.constant 0 : i32
    %c0_i32_0 = arith.constant 0 : i32
    return %1, %c0_i32 : i32, i32
  }
  func.func @transform_1(%arg0: i32, %arg1: i32) -> (i32, i32) {
    %c0_i32 = arith.constant 0 : i32
    %c0_i32_0 = arith.constant 0 : i32
    return %arg0, %c0_i32 : i32, i32
  }
  func.func @transform_2(%arg0: i32, %arg1: i32) -> (i32, i32, i32) {
    %c0_i32 = arith.constant 0 : i32
    %c0_i32_0 = arith.constant 0 : i32
    %c0_i32_1 = arith.constant 0 : i32
    return %arg1, %c0_i32, %c0_i32_0 : i32, i32, i32
  }
  func.func @transform_3(%arg0: i32, %arg1: i32) -> (i32, i32) {
    %c0_i32 = arith.constant 0 : i32
    %c0_i32_0 = arith.constant 0 : i32
    %c0_i32_1 = arith.constant 0 : i32
    return %c0_i32, %c0_i32_0 : i32, i32
  }
  func.func @transform_4(%arg0: i32, %arg1: i32) -> (i32, i32) {
    %c0_i32 = arith.constant 0 : i32
    %c0_i32_0 = arith.constant 0 : i32
    %c0_i32_1 = arith.constant 0 : i32
    return %c0_i32, %c0_i32_0 : i32, i32
  }
  func.func @transform_5(%arg0: i32, %arg1: i32) -> (i32, i32) {
    %c1_i32 = arith.constant 1 : i32
    %0 = arith.muli %arg1, %c1_i32 : i32
    %1 = arith.addi %0, %arg0 : i32
    %c0_i32 = arith.constant 0 : i32
    %c0_i32_0 = arith.constant 0 : i32
    return %1, %c0_i32 : i32, i32
  }
}

</mosaic_0001>

<bundles_post_ra>
// kernel: tpu_custom_call.1
= control target key start
LH: loop header
LB: loop body
LE: loop exit
PB: predicated region body
PF: predicated region fallthrough
CT: control target
= control target key end

     0   :  { %10 = vsyncpa [#allocation3], 0  ;;  %s2253_s0 = inlined_call_operand.vmem [shape: bf16[512,16], index: 0, kind: input, shape index: {}]   ;;  %s2254_s1 = inlined_call_operand.vmem [shape: f32[256,50], index: 1, kind: input, shape index: {}]   ;;  %s2255_s2 = inlined_call_operand.vmem [shape: f32[2,50,128], index: 2, kind: input, shape index: {}]   ;;  %s2256_s3 = inlined_call_operand.vmem [shape: bf16[16,128], index: 3, kind: input, shape index: {}]   ;;  %s2257_s4 = inlined_call_operand.vmem [shape: f32[1,128], index: 4, kind: input, shape index: {}]   ;;  %s2258_s5 = inlined_call_operand.hbm [shape: bf16[512,128], index: 5, kind: output, shape index: {}]  }
   0x1   :  { %12 = vsyncpa [#allocation3 + $0x1], 0  ;;  %s1910_s18 = smov 0   ;;  %s1912_s19 = smov 0  }
   0x2   :  { %s1914_s20 = smov 0   ;;  %s1916_s21 = smov 0  }
   0x3   :  { %s1918_s22 = smov 0   ;;  %s1920_s23 = smov 0  }
   0x4 LB: > { %s1330_s24 = sadd.s32 4294967295, %s1875_s23   ;;  %s1331_s25 = sadd.s32 4294967294, %s1875_s23   ;;  %s1875_s23 = sphi %s1920_s23, %s18_s23   ;;  %s1871_s22 = sphi %s1918_s22, %s2265_s22   ;;  %s1867_s21 = sphi %s1916_s21, %s2264_s21   ;;  %s1863_s20 = sphi %s1914_s20, %s2263_s20   ;;  %s1859_s19 = sphi %s1912_s19, %s2262_s19   ;;  %s1855_s18 = sphi %s1910_s18, %s2261_s18  }
   0x5   : > { %s27_s26 = sadd.s32 1, %s1871_s22  ;;  %s161_s27 = sadd.s32 1, %s1863_s20 }
   0x6   : > { %p28_p0 = scmp.ge.s32.totalorder %s27_s26, 2  ;;  %p171_p1 = scmp.ne.s32.totalorder %s1863_s20, %s1859_s19 }
   0x7   : > { %p172_p2 = scmp.eq.s32.totalorder %s1330_s24, 1  ;;  %p177_p3 = scmp.ne.s32.totalorder %s1859_s19, %s1855_s18 }
   0x8   : > { %s2267_s26 = smov (%p28_p0, %s27_s26), 0  ;;  %p178_p5 = scmp.eq.s32.totalorder %s1331_s25, 1 }
   0x9   : > { %p1950_p4 = por %p172_p2, %p171_p1  ;;  %s158_s29 = ssub.s32 %s1871_s22, %s2267_s26 }
   0xa   : > { %p1335_p6 = scmp.ge.s32.totalorder %s1875_s23, 1  ;;  %p159_p7 = scmp.eq.s32.totalorder %s158_s29, 0 }
   0xb   : > { %p1957_p8 = por %p178_p5, %p177_p3  ;;  %p230_p9 = scmp.lt.s32.totalorder %s1875_s23, 3 }
   0xc   : > { %s1963_s6 = scalar_select %p159_p7, %s1863_s20, %s161_s27  }
   0xd   : > { %p231_p10 = pnand %p1335_p6, %p230_p9 }
   0xe   : > { %p283_p11 = scmp.lt.s32.totalorder (!%p231_p10), %s1867_s21, 1  ;;  %s1337_s9 = sshll.u32 (!%p231_p10), %s1867_s21, 5 }
   0xf   : > { %234 = sbr.rel (%p231_p10) target bundleno = 317 (0x13d), region = 40  ;;  %p271_p12 = scmp.lt.s32.totalorder (!%p231_p10), %s1337_s9, 63 }
  0x10   : > { %s1877_s7 = smov (!%p231_p10), [#allocation2]  }
  0x11   : > { %s1803_s8 = sshll.u32 (!%p231_p10), %s1877_s7, 4  ;;  %s1804_s8 = int_to_ptr.vmem [resolvable:$false] %s1803_s8 }
  0x14   : > { %v1782_v0 = vld [vmem:[%s2256_s3] sm:$0xff]   ;;  %vm364_vm0 = vcmask 408576   ;;  %s284_s12 = scalar_select %p283_p11, %s1867_s21, 1  ;;  %vm461_vm1 = vcmask 1041408   ;;  %vm776_vm2 = vcmask 130048   ;;  %v326_v14 = vld [vmem:[%s2254_s1 + $0x8] sm:$0xff] }
  0x15   : > { %v325_v1 = vld [vmem:[%s2254_s1] sm:$0xff]  ;;  %1690 = vmatprep.subr.bf16.mxu1 %v1782_v0  ;;  %s2269_s9 = smov (!%p271_p12, %s1337_s9), 63  ;;  %v327_v15 = vld [vmem:[%s2254_s1 + $0x10] sm:$0xff]  ;;  %v328_v16 = vld [vmem:[%s2254_s1 + $0x18] sm:$0xff] }
  0x16   : > { %1642 = vmatprep.mubr.msk.f32.mxu0 %vm364_vm0, %v325_v1  ;;  %s1724_s13 = smul.u32 56, %s284_s12  ;;  %1691 = vmatpush3.bf16.msra.mxu1 %v1782_v0  ;;  %s1338_s17 = sshll.u32 %s2269_s9, 2  ;;  %v329_v17 = vld [vmem:[%s2254_s1 + $0x20] sm:$0xff]  ;;  %v330_v20 = vld [vmem:[%s2254_s1 + $0x28] sm:$0xff]  ;;  %v331_v21 = vld [vmem:[%s2254_s1 + $0x30] sm:$0xff] }
  0x17   : > { %s1981_s27 = scalar_lea.vmem %s2253_s0, %s1338_s17  ;;  %v332_v22 = vld [vmem:[%s2254_s1 + $0x38] sm:$0xff]  ;;  %v333_v23 = vld [vmem:[%s2254_s1 + $0x40] sm:$0xff]  ;;  %v334_v26 = vld [vmem:[%s2254_s1 + $0x48] sm:$0xff]  ;;  %s1805_s9 = scalar_lea.vmem %s1804_s8, 4096 }
  0x18   : > { %s287_s16 = scalar_lea.vmem %s2255_s2, %s1724_s13  ;;  %v1783_v5 = vld [vmem:[%s1981_s27] sm:$0xff]   ;;  %v1784_v6 = vld [vmem:[%s1981_s27 + $0x8] sm:$0xff]   ;;  %v1785_v8 = vld [vmem:[%s1981_s27 + $0x10] sm:$0xff]   ;;  %s266_s13 = sand.u32 1, %s1859_s19  }
  0x19   : > { %v363_v2 = vld [vmem:[%s287_s16 + $0x30] sm:$0x3]  ;;  %v362_v3 = vld [vmem:[%s287_s16 + $0x28] sm:$0xff]  ;;  %v361_v4 = vld [vmem:[%s287_s16 + $0x20] sm:$0xff]  ;;  %1692 = vmatprep.mubr.msk.bf16.mxu1 %vm776_vm2, %v1783_v5  ;;  %s1336_s14 = sshll.u32 %s266_s13, 7  ;;  %s2208_s29 = scalar_lea.sflag [#allocation3], %s266_s13 }
  0x1a   : > { %1628 = vmatprep.subr.msk.mxu0 %vm461_vm1, %v363_v2  ;;  %v360_v7 = vld [vmem:[%s287_s16 + $0x18] sm:$0xff]  ;;  %1693 = vmatmul.mubr.msk.bf16.vlgmr.msra.gmra.mxu1 %vm776_vm2, %v1784_v6  ;;  %v359_v9 = vld [vmem:[%s287_s16 + $0x10] sm:$0xff]  ;;  %v358_v10 = vld [vmem:[%s287_s16 + $0x8] sm:$0xff]  ;;  %s2151_s15 = scalar_lea.vmem [#allocation2], %s1336_s14 }
  0x1b   : > { %1629 = vmatpush3.msk.msra.mxu0 %vm461_vm1, %v363_v2  ;;  %1696 = vmatprep.mubr.msk.bf16.mxu1 %vm776_vm2, %v1785_v8  ;;  %v357_v11 = vld [vmem:[%s287_s16] sm:$0xff]  ;;  %v1786_v12 = vld [vmem:[%s1981_s27 + $0x18] sm:$0xff]   ;;  %v1788_v18 = vld [vmem:[%s1981_s27 + $0x28] sm:$0xff]   ;;  %s1476_s16 = sshll.u32 %s1867_s21, 11 }
  0x1c   : > { %1630 = vmatprep.subr.mxu0 %v362_v3  ;;  %v1787_v13 = vld [vmem:[%s1981_s27 + $0x20] sm:$0xff]   ;;  %v1789_v19 = vld [vmem:[%s1981_s27 + $0x30] sm:$0xff]   ;;  %v1790_v24 = vld [vmem:[%s1981_s27 + $0x38] sm:$0xff]   ;;  %s2201_s25 = scalar_lea.hbm %s2258_s5, %s1476_s16 }
  0x1d   : > { %1631 = vmatpush3.msra.mxu0 %v362_v3  ;;  %v1791_v25 = vld [vmem:[%s1981_s27 + $0x40] sm:$0xff]   ;;  %v335_v27 = vld [vmem:[%s2254_s1 + $0x50] sm:$0xff]  ;;  %v336_v28 = vld [vmem:[%s2254_s1 + $0x58] sm:$0xff] }
  0x1e   : > { %1632 = vmatprep.subr.mxu0 %v361_v4  ;;  %v337_v29 = vld [vmem:[%s2254_s1 + $0x60] sm:$0xff]  ;;  %v1792_v30 = vld [vmem:[%s1981_s27 + $0x48] sm:$0xff]   ;;  %v1793_v31 = vld [vmem:[%s1981_s27 + $0x50] sm:$0xff]  }
  0x1f   : > { %1633 = vmatpush3.msra.mxu0 %v361_v4  ;;  %v338_v32 = vld [vmem:[%s2254_s1 + $0x68] sm:$0xff]  ;;  %v339_v33 = vld [vmem:[%s2254_s1 + $0x70] sm:$0xff]  ;;  %v340_v34 = vld [vmem:[%s2254_s1 + $0x78] sm:$0xff] }
  0x20   : > { %1634 = vmatprep.subr.mxu0 %v360_v7  ;;  %v341_v35 = vld [vmem:[%s2254_s1 + $0x80] sm:$0xff]  ;;  %v1794_v36 = vld [vmem:[%s1981_s27 + $0x58] sm:$0xff]   ;;  %v342_v38 = vld [vmem:[%s2254_s1 + $0x88] sm:$0xff] }
  0x21   : > { %1635 = vmatpush3.msra.mxu0 %v360_v7  ;;  %v1795_v37 = vld [vmem:[%s1981_s27 + $0x60] sm:$0xff]   ;;  %v343_v39 = vld [vmem:[%s2254_s1 + $0x90] sm:$0xff]  ;;  %v344_v40 = vld [vmem:[%s2254_s1 + $0x98] sm:$0xff] }
  0x22   : > { %1636 = vmatprep.subr.mxu0 %v359_v9  ;;  %1697 = vmatmul.mubr.msk.bf16.gmra.mxu1 %vm776_vm2, %v1786_v12  ;;  %v345_v41 = vld [vmem:[%s2254_s1 + $0xa0] sm:$0xff]  ;;  %v1796_v42 = vld [vmem:[%s1981_s27 + $0x68] sm:$0xff]   ;;  %v1797_v43 = vld [vmem:[%s1981_s27 + $0x70] sm:$0xff]  }
  0x23   : > { %1637 = vmatpush3.msra.mxu0 %v359_v9  ;;  %1700 = vmatprep.mubr.msk.bf16.mxu1 %vm776_vm2, %v1787_v13  ;;  %v346_v44 = vld [vmem:[%s2254_s1 + $0xa8] sm:$0xff]  ;;  %v347_v45 = vld [vmem:[%s2254_s1 + $0xb0] sm:$0xff]  ;;  %v348_v46 = vld [vmem:[%s2254_s1 + $0xb8] sm:$0xff] }
  0x24   : > { %1638 = vmatprep.subr.mxu0 %v358_v10  ;;  %v349_v47 = vld [vmem:[%s2254_s1 + $0xc0] sm:$0xff]  ;;  %v1798_v48 = vld [vmem:[%s1981_s27 + $0x78] sm:$0xff]   ;;  %v350_v49 = vld [vmem:[%s2254_s1 + $0xc8] sm:$0xff]  ;;  %s1232_s27 = sshll.u32 %s2151_s15, 4  ;;  %s2203_s27 = int_to_ptr.vmem [resolvable:$true] %s1232_s27 }
  0x25   : > { %1639 = vmatpush3.msra.mxu0 %v358_v10  ;;  %v351_v50 = vld [vmem:[%s2254_s1 + $0xd0] sm:$0xff]  ;;  %v352_v51 = vld [vmem:[%s2254_s1 + $0xd8] sm:$0xff]  ;;  %v353_v52 = vld [vmem:[%s2254_s1 + $0xe0] sm:$0xff]  ;;  %s1799_s21 = scalar_lea.vmem %s2203_s27, 2048  ;;  %p1806_p2 = scmp.lt.s32.totalorder %s2203_s27, %s1804_s8 }
  0x26   : > { %1640 = vmatprep.subr.mxu0 %v357_v11  ;;  %v354_v53 = vld [vmem:[%s2254_s1 + $0xe8] sm:$0xff]  ;;  %v355_v54 = vld [vmem:[%s2254_s1 + $0xf0] sm:$0xff]  ;;  %v356_v55 = vld [vmem:[%s2254_s1 + $0xf8] sm:$0xff]  ;;  %p1800_p13 = scmp.ne.s32.totalorder %s2203_s27, %s1799_s21  ;;  %p1807_p3 = scmp.lt.s32.totalorder %s1805_s9, %s1799_s21 }
  0x27   : > { %1641 = vmatpush3.msra.mxu0 %v357_v11  ;;  %v2142_v62 = vld [vmem:[%s2257_s4] ss:$0 sm:$0xff] }
  0x28   : > { %1643 = vmatmul.mubr.msk.f32.vlgmr.msra.gmra.mxu0 %vm364_vm0, %v326_v14  ;;  %p1801_p0 = pnand %p1800_p13, %p1950_p4  ;;  %p1808_p5 = por %p1807_p3, %p1806_p2 }
  0x29   : > { %1645 = vmatprep.mubr.msk.f32.mxu0 %vm364_vm0, %v327_v15 }
  0x2a   : > { %1701 = vmatmul.mubr.msk.bf16.gmra.mxu1 %vm776_vm2, %v1788_v18  ;;  %p1802_p1 = pneg %p1801_p0 }
  0x2b   : > { %1704 = vmatprep.mubr.msk.bf16.mxu1 %vm776_vm2, %v1789_v19 }
  0x2c   : > { %1646 = vmatmul.mubr.msk.f32.gmra.mxu0 %vm364_vm0, %v328_v16  ;;  %p1809_p6 = pnand %p1808_p5, %p1802_p1 }
  0x2d   : > { %1648 = vmatprep.mubr.msk.f32.mxu0 %vm364_vm0, %v329_v17 }
  0x30   : > { %1649 = vmatmul.mubr.msk.f32.gmra.mxu0 %vm364_vm0, %v330_v20 }
  0x31   : > { %1651 = vmatprep.mubr.msk.f32.mxu0 %vm364_vm0, %v331_v21 }
  0x32   : > { %1705 = vmatmul.mubr.msk.bf16.gmra.mxu1 %vm776_vm2, %v1790_v24 }
  0x33   : > { %1708 = vmatprep.mubr.msk.bf16.mxu1 %vm776_vm2, %v1791_v25 }
  0x34   : > { %1652 = vmatmul.mubr.msk.f32.gmra.mxu0 %vm364_vm0, %v332_v22 }
  0x35   : > { %1654 = vmatprep.mubr.msk.f32.mxu0 %vm364_vm0, %v333_v23 }
  0x38   : > { %1655 = vmatmul.mubr.msk.f32.gmra.mxu0 %vm364_vm0, %v334_v26 }
  0x39   : > { %1657 = vmatprep.mubr.msk.f32.mxu0 %vm364_vm0, %v335_v27 }
  0x3a   : > { %1709 = vmatmul.mubr.msk.bf16.gmra.mxu1 %vm776_vm2, %v1792_v30 }
  0x3b   : > { %1712 = vmatprep.mubr.msk.bf16.mxu1 %vm776_vm2, %v1793_v31 }
  0x3c   : > { %1658 = vmatmul.mubr.msk.f32.gmra.mxu0 %vm364_vm0, %v336_v28 }
  0x3d   : > { %1660 = vmatprep.mubr.msk.f32.mxu0 %vm364_vm0, %v337_v29 }
  0x40   : > { %1661 = vmatmul.mubr.msk.f32.gmra.mxu0 %vm364_vm0, %v338_v32 }
  0x41   : > { %1663 = vmatprep.mubr.msk.f32.mxu0 %vm364_vm0, %v339_v33 }
  0x42   : > { %1713 = vmatmul.mubr.msk.bf16.gmra.mxu1 %vm776_vm2, %v1794_v36 }
  0x43   : > { %1716 = vmatprep.mubr.msk.bf16.mxu1 %vm776_vm2, %v1795_v37 }
  0x44   : > { %1664 = vmatmul.mubr.msk.f32.gmra.mxu0 %vm364_vm0, %v340_v34 }
  0x45   : > { %1666 = vmatprep.mubr.msk.f32.mxu0 %vm364_vm0, %v341_v35 }
  0x48   : > { %1667 = vmatmul.mubr.msk.f32.gmra.mxu0 %vm364_vm0, %v342_v38 }
  0x49   : > { %1669 = vmatprep.mubr.msk.f32.mxu0 %vm364_vm0, %v343_v39 }
  0x4a   : > { %1717 = vmatmul.mubr.msk.bf16.gmra.mxu1 %vm776_vm2, %v1796_v42 }
  0x4b   : > { %1720 = vmatprep.mubr.msk.bf16.mxu1 %vm776_vm2, %v1797_v43 }
  0x4c   : > { %1670 = vmatmul.mubr.msk.f32.gmra.mxu0 %vm364_vm0, %v344_v40 }
  0x4d   : > { %1672 = vmatprep.mubr.msk.f32.mxu0 %vm364_vm0, %v345_v41 }
  0x50   : > { %1673 = vmatmul.mubr.msk.f32.gmra.mxu0 %vm364_vm0, %v346_v44 }
  0x51   : > { %1675 = vmatprep.mubr.msk.f32.mxu0 %vm364_vm0, %v347_v45 }
  0x52   : > { %1721 = vmatmul.mubr.msk.bf16.gmra.mxu1 %vm776_vm2, %v1798_v48 }
  0x54   : > { %1676 = vmatmul.mubr.msk.f32.gmra.mxu0 %vm364_vm0, %v348_v46 }
  0x55   : > { %1678 = vmatprep.mubr.msk.f32.mxu0 %vm364_vm0, %v349_v47 }
  0x58   : > { %1679 = vmatmul.mubr.msk.f32.gmra.mxu0 %vm364_vm0, %v350_v49 }
  0x59   : > { %1681 = vmatprep.mubr.msk.f32.mxu0 %vm364_vm0, %v351_v50 }
  0x5c   : > { %1682 = vmatmul.mubr.msk.f32.gmra.mxu0 %vm364_vm0, %v352_v51 }
  0x5d   : > { %1684 = vmatprep.mubr.msk.f32.mxu0 %vm364_vm0, %v353_v52 }
  0x60   : > { %1685 = vmatmul.mubr.msk.f32.gmra.mxu0 %vm364_vm0, %v354_v53 }
  0x61   : > { %1687 = vmatprep.mubr.msk.f32.mxu0 %vm364_vm0, %v355_v54 }
  0x64   : > { %1688 = vmatmul.mubr.msk.f32.gmra.mxu0 %vm364_vm0, %v356_v55 }
  0xda   : > { %v1694_v56 = vpop.f32.mrf.mxu1 }
  0xdc   : > { %v859_v57 = vpop.f32.mrf.mxu1 }
  0xde   : > { %v1695_v58 = vpop.f32.mrf.mxu1 }
  0xe0   : > { %v862_v59 = vpop.f32.mrf.mxu1 }
  0xe2   : > { %v1698_v60 = vpop.f32.mrf.mxu1 }
  0xe4   : > { %v875_v63 = vpop.f32.mrf.mxu1 }
  0xe6   : > { %v1699_v2 = vpop.f32.mrf.mxu1 }
  0xe8   : > { %v1644_v61 = vpop.f32.mrf.mxu0  ;;  %v878_v6 = vpop.f32.mrf.mxu1 }
  0xe9   : > { %v863_v0 = vadd.f32 %v1644_v61, %v862_v59 }
  0xea   : > { %v531_v1 = vpop.f32.mrf.mxu0  ;;  %v1702_v10 = vpop.f32.mrf.mxu1 }
  0xeb   : > { %v994_v3 = vadd.f32 %v2142_v62, %v863_v0  ;;  %v860_v4 = vadd.f32 %v859_v57, %v531_v1 }
  0xec   : > { %v1647_v5 = vpop.f32.mrf.mxu0  ;;  %v891_v16 = vpop.f32.mrf.mxu1 }
  0xed   : > { %v993_v7 = vadd.f32 %v2142_v62, %v860_v4  ;;  %v871_v8 = vadd.f32 %v1695_v58, %v1647_v5  ;;  %v1026_v11 = vmax.f32 %v994_v3, 0.0 }
  0xee   : > { %v541_v9 = vpop.f32.mrf.mxu0  ;;  %v1703_v21 = vpop.f32.mrf.mxu1 }
  0xef   : > { %v1025_v12 = vmax.f32 %v993_v7, 0.0  ;;  %v996_v13 = vadd.f32 %v2142_v62, %v871_v8  ;;  %v868_v14 = vadd.f32 %v1694_v56, %v541_v9 }
  0xf0   : > { %v1650_v15 = vpop.f32.mrf.mxu0  ;;  %v894_v27 = vpop.f32.mrf.mxu1 }
  0xf1   : > { %v1480_v17 = vpack.c.bf16 %v1026_v11, %v1025_v12  ;;  %v995_v18 = vadd.f32 %v2142_v62, %v868_v14  ;;  %v879_v19 = vadd.f32 %v1650_v15, %v878_v6  ;;  %v1028_v22 = vmax.f32 %v996_v13, 0.0 }
  0xf2   : > { %v551_v20 = vpop.f32.mrf.mxu0  ;;  %v1706_v32 = vpop.f32.mrf.mxu1 }
  0xf3   : > { %1481 = vst [vmem:[%s2151_s15] sm:$0xff] %v1480_v17   ;;  %v1027_v23 = vmax.f32 %v995_v18, 0.0  ;;  %v998_v24 = vadd.f32 %v2142_v62, %v879_v19  ;;  %v876_v25 = vadd.f32 %v875_v63, %v551_v20 }
  0xf4   : > { %v1653_v26 = vpop.f32.mrf.mxu0  ;;  %v907_v38 = vpop.f32.mrf.mxu1 }
  0xf5   : > { %v1485_v28 = vpack.c.bf16 %v1028_v22, %v1027_v23  ;;  %v997_v29 = vadd.f32 %v2142_v62, %v876_v25  ;;  %v887_v30 = vadd.f32 %v1699_v2, %v1653_v26  ;;  %v1030_v33 = vmax.f32 %v998_v24, 0.0 }
  0xf6   : > { %v561_v31 = vpop.f32.mrf.mxu0  ;;  %v1707_v43 = vpop.f32.mrf.mxu1 }
  0xf7   : > { %1557 = vst [vmem:[%s2151_s15 + $0x8] sm:$0xff] %v1485_v28   ;;  %v1029_v34 = vmax.f32 %v997_v29, 0.0  ;;  %v1000_v35 = vadd.f32 %v2142_v62, %v887_v30  ;;  %v884_v36 = vadd.f32 %v1698_v60, %v561_v31 }
  0xf8   : > { %v1656_v37 = vpop.f32.mrf.mxu0  ;;  %v910_v49 = vpop.f32.mrf.mxu1 }
  0xf9   : > { %v1490_v39 = vpack.c.bf16 %v1030_v33, %v1029_v34  ;;  %v999_v40 = vadd.f32 %v2142_v62, %v884_v36  ;;  %v895_v41 = vadd.f32 %v1656_v37, %v894_v27  ;;  %v1032_v44 = vmax.f32 %v1000_v35, 0.0 }
  0xfa   : > { %v571_v42 = vpop.f32.mrf.mxu0  ;;  %v1710_v54 = vpop.f32.mrf.mxu1 }
  0xfb   : > { %1558 = vst [vmem:[%s2151_s15 + $0x10] sm:$0xff] %v1490_v39   ;;  %v1031_v45 = vmax.f32 %v999_v40, 0.0  ;;  %v1002_v46 = vadd.f32 %v2142_v62, %v895_v41  ;;  %v892_v47 = vadd.f32 %v891_v16, %v571_v42 }
  0xfc   : > { %v1659_v48 = vpop.f32.mrf.mxu0  ;;  %v923_v60 = vpop.f32.mrf.mxu1 }
  0xfd   : > { %v1495_v50 = vpack.c.bf16 %v1032_v44, %v1031_v45  ;;  %v1001_v51 = vadd.f32 %v2142_v62, %v892_v47  ;;  %v903_v52 = vadd.f32 %v1703_v21, %v1659_v48  ;;  %v1034_v55 = vmax.f32 %v1002_v46, 0.0 }
  0xfe   : > { %v581_v53 = vpop.f32.mrf.mxu0  ;;  %v1711_v2 = vpop.f32.mrf.mxu1 }
  0xff   : > { %1559 = vst [vmem:[%s2151_s15 + $0x18] sm:$0xff] %v1495_v50   ;;  %v1033_v56 = vmax.f32 %v1001_v51, 0.0  ;;  %v1004_v57 = vadd.f32 %v2142_v62, %v903_v52  ;;  %v900_v58 = vadd.f32 %v1702_v10, %v581_v53 }
 0x100   : > { %v1662_v59 = vpop.f32.mrf.mxu0  ;;  %v926_v8 = vpop.f32.mrf.mxu1 }
 0x101   : > { %v1500_v61 = vpack.c.bf16 %v1034_v55, %v1033_v56  ;;  %v1003_v63 = vadd.f32 %v2142_v62, %v900_v58  ;;  %v911_v0 = vadd.f32 %v1662_v59, %v910_v49  ;;  %v1036_v3 = vmax.f32 %v1004_v57, 0.0 }
 0x102   : > { %v591_v1 = vpop.f32.mrf.mxu0  ;;  %v1714_v13 = vpop.f32.mrf.mxu1 }
 0x103   : > { %1560 = vst [vmem:[%s2151_s15 + $0x20] sm:$0xff] %v1500_v61   ;;  %v1035_v4 = vmax.f32 %v1003_v63, 0.0  ;;  %v1006_v5 = vadd.f32 %v2142_v62, %v911_v0  ;;  %v908_v6 = vadd.f32 %v907_v38, %v591_v1 }
 0x104   : > { %v1665_v7 = vpop.f32.mrf.mxu0  ;;  %v939_v19 = vpop.f32.mrf.mxu1 }
 0x105   : > { %v1505_v9 = vpack.c.bf16 %v1036_v3, %v1035_v4  ;;  %v1005_v10 = vadd.f32 %v2142_v62, %v908_v6  ;;  %v919_v11 = vadd.f32 %v1707_v43, %v1665_v7  ;;  %v1038_v14 = vmax.f32 %v1006_v5, 0.0 }
 0x106   : > { %v601_v12 = vpop.f32.mrf.mxu0  ;;  %v1715_v24 = vpop.f32.mrf.mxu1 }
 0x107   : > { %1561 = vst [vmem:[%s2151_s15 + $0x28] sm:$0xff] %v1505_v9   ;;  %v1037_v15 = vmax.f32 %v1005_v10, 0.0  ;;  %v1008_v16 = vadd.f32 %v2142_v62, %v919_v11  ;;  %v916_v17 = vadd.f32 %v1706_v32, %v601_v12 }
 0x108   : > { %v1668_v18 = vpop.f32.mrf.mxu0  ;;  %v942_v30 = vpop.f32.mrf.mxu1 }
 0x109   : > { %v1510_v20 = vpack.c.bf16 %v1038_v14, %v1037_v15  ;;  %v1007_v21 = vadd.f32 %v2142_v62, %v916_v17  ;;  %v927_v22 = vadd.f32 %v1668_v18, %v926_v8  ;;  %v1040_v25 = vmax.f32 %v1008_v16, 0.0 }
 0x10a   : > { %v611_v23 = vpop.f32.mrf.mxu0  ;;  %v1718_v35 = vpop.f32.mrf.mxu1 }
 0x10b   : > { %1562 = vst [vmem:[%s2151_s15 + $0x30] sm:$0xff] %v1510_v20   ;;  %v1039_v26 = vmax.f32 %v1007_v21, 0.0  ;;  %v1010_v27 = vadd.f32 %v2142_v62, %v927_v22  ;;  %v924_v28 = vadd.f32 %v923_v60, %v611_v23 }
 0x10c   : > { %v1671_v29 = vpop.f32.mrf.mxu0  ;;  %v955_v41 = vpop.f32.mrf.mxu1 }
 0x10d   : > { %v1515_v31 = vpack.c.bf16 %v1040_v25, %v1039_v26  ;;  %v1009_v32 = vadd.f32 %v2142_v62, %v924_v28  ;;  %v935_v33 = vadd.f32 %v1711_v2, %v1671_v29  ;;  %v1042_v36 = vmax.f32 %v1010_v27, 0.0 }
 0x10e   : > { %v621_v34 = vpop.f32.mrf.mxu0  ;;  %v1719_v46 = vpop.f32.mrf.mxu1 }
 0x10f   : > { %1563 = vst [vmem:[%s2151_s15 + $0x38] sm:$0xff] %v1515_v31   ;;  %v1041_v37 = vmax.f32 %v1009_v32, 0.0  ;;  %v1012_v38 = vadd.f32 %v2142_v62, %v935_v33  ;;  %v932_v39 = vadd.f32 %v1710_v54, %v621_v34 }
 0x110   : > { %v1674_v40 = vpop.f32.mrf.mxu0  ;;  %v958_v52 = vpop.f32.mrf.mxu1 }
 0x111   : > { %v1520_v42 = vpack.c.bf16 %v1042_v36, %v1041_v37  ;;  %v1011_v43 = vadd.f32 %v2142_v62, %v932_v39  ;;  %v943_v44 = vadd.f32 %v1674_v40, %v942_v30  ;;  %v1044_v47 = vmax.f32 %v1012_v38, 0.0 }
 0x112   : > { %v631_v45 = vpop.f32.mrf.mxu0  ;;  %v1722_v57 = vpop.f32.mrf.mxu1 }
 0x113   : > { %1564 = vst [vmem:[%s2151_s15 + $0x40] sm:$0xff] %v1520_v42   ;;  %v1043_v48 = vmax.f32 %v1011_v43, 0.0  ;;  %v1014_v49 = vadd.f32 %v2142_v62, %v943_v44  ;;  %v940_v50 = vadd.f32 %v939_v19, %v631_v45 }
 0x114   : > { %v1677_v51 = vpop.f32.mrf.mxu0  ;;  %v971_v0 = vpop.f32.mrf.mxu1 }
 0x115   : > { %v1525_v53 = vpack.c.bf16 %v1044_v47, %v1043_v48  ;;  %v1013_v54 = vadd.f32 %v2142_v62, %v940_v50  ;;  %v951_v55 = vadd.f32 %v1715_v24, %v1677_v51  ;;  %v1046_v58 = vmax.f32 %v1014_v49, 0.0 }
 0x116   : > { %v641_v56 = vpop.f32.mrf.mxu0  ;;  %v1723_v5 = vpop.f32.mrf.mxu1 }
 0x117   : > { %1565 = vst [vmem:[%s2151_s15 + $0x48] sm:$0xff] %v1525_v53   ;;  %v1045_v59 = vmax.f32 %v1013_v54, 0.0  ;;  %v1016_v60 = vadd.f32 %v2142_v62, %v951_v55  ;;  %v948_v61 = vadd.f32 %v1714_v13, %v641_v56 }
 0x118   : > { %v1680_v63 = vpop.f32.mrf.mxu0  ;;  %v974_v15 = vpop.f32.mrf.mxu1 }
 0x119   : > { %v1530_v1 = vpack.c.bf16 %v1046_v58, %v1045_v59  ;;  %v1015_v2 = vadd.f32 %v2142_v62, %v948_v61  ;;  %v959_v3 = vadd.f32 %v1680_v63, %v958_v52  ;;  %v1048_v6 = vmax.f32 %v1016_v60, 0.0 }
 0x11a   : > { %v651_v4 = vpop.f32.mrf.mxu0 }
 0x11b   : > { %1566 = vst [vmem:[%s2151_s15 + $0x50] sm:$0xff] %v1530_v1   ;;  %v1047_v7 = vmax.f32 %v1015_v2, 0.0  ;;  %v1018_v8 = vadd.f32 %v2142_v62, %v959_v3  ;;  %v956_v9 = vadd.f32 %v955_v41, %v651_v4 }
 0x11c   : > { %v1683_v10 = vpop.f32.mrf.mxu0 }
 0x11d   : > { %v1535_v11 = vpack.c.bf16 %v1048_v6, %v1047_v7  ;;  %v1017_v12 = vadd.f32 %v2142_v62, %v956_v9  ;;  %v967_v13 = vadd.f32 %v1719_v46, %v1683_v10  ;;  %v1050_v16 = vmax.f32 %v1018_v8, 0.0 }
 0x11e   : > { %v661_v14 = vpop.f32.mrf.mxu0 }
 0x11f   : > { %1567 = vst [vmem:[%s2151_s15 + $0x58] sm:$0xff] %v1535_v11   ;;  %v1049_v17 = vmax.f32 %v1017_v12, 0.0  ;;  %v1020_v18 = vadd.f32 %v2142_v62, %v967_v13  ;;  %v964_v19 = vadd.f32 %v1718_v35, %v661_v14 }
 0x120   : > { %v1686_v20 = vpop.f32.mrf.mxu0 }
 0x121   : > { %v1540_v21 = vpack.c.bf16 %v1050_v16, %v1049_v17  ;;  %v1019_v22 = vadd.f32 %v2142_v62, %v964_v19  ;;  %v975_v23 = vadd.f32 %v1686_v20, %v974_v15  ;;  %v1052_v25 = vmax.f32 %v1020_v18, 0.0 }
 0x122   : > { %v671_v24 = vpop.f32.mrf.mxu0 }
 0x123   : > { %1568 = vst [vmem:[%s2151_s15 + $0x60] sm:$0xff] %v1540_v21   ;;  %v1051_v26 = vmax.f32 %v1019_v22, 0.0  ;;  %v1022_v27 = vadd.f32 %v2142_v62, %v975_v23  ;;  %v972_v28 = vadd.f32 %v971_v0, %v671_v24 }
 0x124   : > { %v1689_v29 = vpop.f32.mrf.mxu0 }
 0x125   : > { %v1545_v30 = vpack.c.bf16 %v1052_v25, %v1051_v26  ;;  %v1021_v31 = vadd.f32 %v2142_v62, %v972_v28  ;;  %v983_v32 = vadd.f32 %v1723_v5, %v1689_v29  ;;  %v1054_v34 = vmax.f32 %v1022_v27, 0.0 }
 0x126   : > { %v681_v33 = vpop.f32.mrf.mxu0 }
 0x127   : > { %1569 = vst [vmem:[%s2151_s15 + $0x68] sm:$0xff] %v1545_v30   ;;  %v1053_v35 = vmax.f32 %v1021_v31, 0.0  ;;  %v1024_v36 = vadd.f32 %v2142_v62, %v983_v32  ;;  %v980_v37 = vadd.f32 %v1722_v57, %v681_v33 }
 0x129   : > { %v1550_v38 = vpack.c.bf16 %v1054_v34, %v1053_v35  ;;  %v1023_v39 = vadd.f32 %v2142_v62, %v980_v37  ;;  %v1056_v40 = vmax.f32 %v1024_v36, 0.0 }
 0x12b   : > { %1570 = vst [vmem:[%s2151_s15 + $0x70] sm:$0xff] %v1550_v38   ;;  %v1055_v41 = vmax.f32 %v1023_v39, 0.0 }
 0x12d   : > { %v1555_v42 = vpack.c.bf16 %v1056_v40, %v1055_v41 }
 0x12f   : > { %1571 = vst [vmem:[%s2151_s15 + $0x78] sm:$0xff] %v1555_v42  }
 0x130   : > { %1812 = shalt.err (!%p1809_p6)
}
 0x131   : > { %s1813_s10 = scalar_lea.hbm %s2201_s25, 2048  ;;  %s1817_s13 = scalar_lea.hbm %s2258_s5, 4096 }
 0x132   : > { %p1814_p7 = scmp.ne.s32.totalorder %s2201_s25, %s1813_s10  ;;  %p1818_p11 = scmp.lt.s32.totalorder %s2201_s25, %s2258_s5 }
 0x133   : > { %p1819_p12 = scmp.lt.s32.totalorder %s1817_s13, %s1813_s10 }
 0x134   : > { %p1815_p9 = pnand %p1814_p7, %p1950_p4 }
 0x135   : > { %p1820_p13 = por %p1819_p12, %p1818_p11 }
 0x136   : > { %p1816_p10 = pneg %p1815_p9 }
 0x138   : > { %p1821_p0 = pnand %p1820_p13, %p1816_p10 }
 0x13a   : > { %1824 = shalt.err (!%p1821_p0)
}
 0x13b   : > { %s1878_s16 = smov 64   ;;  %s1879_s17 = smov 4  }
 0x13c   : > { %1725 = dma.vmem_to_hbm [thread:$0]  (%p1950_p4), %s2203_s27, 2048, %s2201_s25, %s2208_s29, %s1878_s16, %s1878_s16, %s1879_s17  }
 0x13d PF: > { %p1731_p1 = scmp.ge.s32.totalorder %s1875_s23, 2  ;;  %s1247_s24 = sand.u32 1, %s1855_s18  }
 0x13e   : > { %s1248_s21 = scalar_lea.sflag [#allocation3], %s1247_s24 }
 0x13f   : > { %p1728_p2 = pnand %p1731_p1, %p1957_p8 }
 0x141   : > { %p1729_p3 = pneg %p1728_p2 }
 0x143   : > { %1850 = dma.done.wait (%p1729_p3), %s1248_s21, 2048  }
 0x144   : > { %1852 = vsyncadd (%p1729_p3), %s1248_s21, 4294965248  ;;  %s18_s23 = sadd.s32 1, %s1875_s23   ;;  %s2261_s18 = smov %s1859_s19 }
 0x145   : > { %p15_p5 = scmp.ge.s32.totalorder %s18_s23, 4   ;;  %s2262_s19 = smov %s1863_s20 }
 0x146   : > { %s2263_s20 = smov %s1963_s6  ;;  %s2264_s21 = smov %s1871_s22 }
 0x147   : > { %s2265_s22 = smov %s2267_s26  ;;  %17 = sbr.rel (!%p15_p5) target bundleno = 4 (0x4), region = 81 }
 0x14c   :  { %1253 = vsyncpa [#allocation3], 1 }
 0x14d   :  { %1255 = vsyncpa [#allocation3 + $0x1], 1 }

</bundles_post_ra>
